<compile_context>
chip_gen: v6e
topology: v6e:2x2x1
jax: 0.10.0
libtpu: 0.0.40
codegen_flags: <defaults>
</compile_context>

<pallas_src>
import functools

import jax
import jax.numpy as jnp
from jax.experimental import pallas as pl
from jax.experimental.pallas import tpu as pltpu

_LANES = 128
M_TERMS = 8


def _ceil_div(a, b):
    return -(-a // b)


def _round_up(x, mult):
    return ((x + mult - 1) // mult) * mult


# -----------------------------------------------------------------------------
# Pallas kernel: lane-dense sum-of-squares streaming reduction
# -----------------------------------------------------------------------------
def _sumsq_kernel(td_ref, th_ref, td_out, th_out):
    """Accumulate per-lane sums of squares for time_deriv and theta.

    td_ref : (td_tile, 128)      lane-dense view of time_deriv
    th_ref : (td_tile*M, 128)    lane-dense view of theta (lane j <-> col j%M)
    td_out : (8, 128)            partial sums for this split (row 0 used)
    th_out : (8, 128)            partial sums for this split (row 0 used)
    """
    @pl.when(pl.program_id(1) == 0)
    def _():
        td_out[...] = jnp.zeros_like(td_out)
        th_out[...] = jnp.zeros_like(th_out)

    td = td_ref[...].astype(jnp.float32)
    th = th_ref[...].astype(jnp.float32)

    # Pure VPU square + sublane reduction into resident (1, 128) accumulators;
    # no cross-lane / scalar reduction inside the streaming loop.
    td_out[0:1, :] += jnp.sum(td * td, axis=0, keepdims=True)
    th_out[0:1, :] += jnp.sum(th * th, axis=0, keepdims=True)


@functools.partial(jax.jit, static_argnames=("td_tile_rows", "num_splits"))
def pallas_library_norms(time_deriv, theta, *, td_tile_rows=1024, num_splits=None):
    """norms = ||time_deriv||_F / per-column ||theta||_2  (shape (M,) after squeeze)."""
    n, m = theta.shape
    assert time_deriv.shape == (n, 1)

    if _LANES % m != 0:
        # TODO(synk): lane-dense fold needs M | 128; fall back to plain XLA.
        td_ss = jnp.sum(jnp.square(time_deriv.astype(jnp.float32)))
        col_ss = jnp.sum(jnp.square(theta.astype(jnp.float32)), axis=0)
        return jnp.squeeze(jnp.sqrt(td_ss) / jnp.sqrt(col_ss))

    # ---- tiling (all static, derived from shapes) ---------------------------
    r_td = _ceil_div(n, _LANES)                 # lane-dense rows of time_deriv
    if num_splits is None:
        # Only split the sample axis (v7x: 2 TensorCores) when there is enough
        # data to keep both cores streaming.
        num_splits = 2 if r_td >= 4 * td_tile_rows else 1
    td_tile = max(8, _round_up(min(td_tile_rows, _ceil_div(r_td, num_splits)), 8))
    steps = _ceil_div(r_td, num_splits * td_tile)
    r_td_pad = num_splits * steps * td_tile
    n_pad = r_td_pad * _LANES
    th_tile = td_tile * m                       # same samples per step as td

    # ---- lane-dense views (zero padding leaves sums of squares unchanged) ---
    td_flat = time_deriv.reshape(-1)
    th_2d = theta
    if n_pad != n:
        td_flat = jnp.pad(td_flat, (0, n_pad - n))
        th_2d = jnp.pad(th_2d, ((0, n_pad - n), (0, 0)))
    td_rs = td_flat.reshape(r_td_pad, _LANES)            # (rows, 128)
    th_rs = th_2d.reshape(r_td_pad * m, _LANES)          # lane j <-> column j % m

    td_part, th_part = pl.pallas_call(
        _sumsq_kernel,
        out_shape=(
            jax.ShapeDtypeStruct((num_splits * 8, _LANES), jnp.float32),
            jax.ShapeDtypeStruct((num_splits * 8, _LANES), jnp.float32),
        ),
        grid_spec=pltpu.PrefetchScalarGridSpec(
            num_scalar_prefetch=0,
            grid=(num_splits, steps),
            in_specs=[
                pl.BlockSpec((td_tile, _LANES), lambda c, i: (c * steps + i, 0)),
                pl.BlockSpec((th_tile, _LANES), lambda c, i: (c * steps + i, 0)),
            ],
            out_specs=[
                pl.BlockSpec((8, _LANES), lambda c, i: (c, 0)),
                pl.BlockSpec((8, _LANES), lambda c, i: (c, 0)),
            ],
        ),
        compiler_params=pltpu.CompilerParams(
            dimension_semantics=("parallel", "arbitrary")),
    )(td_rs, th_rs)

    # ---- tiny O(M) epilogue on a few KiB of partial sums (plain JAX) --------
    td_ss = jnp.sum(td_part)
    col_ss = jnp.sum(th_part, axis=0).reshape(_LANES // m, m).sum(axis=0)
    # torch.norm(td) / torch.norm(theta, dim=0, keepdim=True) -> .squeeze()
    return jnp.squeeze(jnp.sqrt(td_ss) / jnp.sqrt(col_ss))


# -----------------------------------------------------------------------------
# Library module (JAX port of the abstract base)
# -----------------------------------------------------------------------------
class Library:
    """forward(input) -> (time_derivs, thetas); stores self.norms (Pallas)."""

    def __init__(self):
        self.norms = None

    def library(self, inputs):
        # TODO(synk): the real `library` is abstract / subclass-specific
        # (autograd derivatives of the network prediction). This deterministic
        # polynomial stand-in only exists so the abstract forward() can run.
        prediction, coords = inputs                      # (N, 1), (N, 2)
        u = prediction
        theta = jnp.concatenate([u ** k for k in range(M_TERMS)], axis=1)  # (N, M)
        time_deriv = jnp.cos(coords[:, :1]) * u                            # (N, 1)
        return [time_deriv], [theta]

    def forward(self, inputs):
        time_derivs, thetas = self.library(inputs)
        # .detach() in torch has no JAX analogue needed here (no grad taken).
        self.norms = [
            pallas_library_norms(td, th)
            for td, th in zip(time_derivs, thetas)
        ]
        return time_derivs, thetas


# -----------------------------------------------------------------------------
# Main
# -----------------------------------------------------------------------------
if __name__ == "__main__":
    key = jax.random.PRNGKey(0)
    k1, k2, k3, k4 = jax.random.split(key, 4)

    # Small shapes consistent with the module: prediction (N,1), coords (N,2).
    N = 256
    prediction = jax.random.normal(k1, (N, 1), dtype=jnp.float32)
    coords = jax.random.normal(k2, (N, 2), dtype=jnp.float32)

    lib = Library()
    time_derivs, thetas = lib.forward((prediction, coords))
    norms = [jax.block_until_ready(x) for x in lib.norms]
    _ = [jax.block_until_ready(t) for t in time_derivs]
    _ = [jax.block_until_ready(t) for t in thetas]

    td, th = time_derivs[0], thetas[0]
    ref = jnp.linalg.norm(td) / jnp.linalg.norm(th, axis=0)
    assert norms[0].shape == (M_TERMS,)
    assert jnp.allclose(norms[0], ref, rtol=1e-4, atol=1e-6)

    # Second (still small) check exercising padding (N % 128 != 0), a
    # multi-step grid, and the 2-way sample split used for v7x's two cores.
    N2 = 6000
    td2 = jax.random.normal(k3, (N2, 1), dtype=jnp.float32)
    th2 = jax.random.normal(k4, (N2, M_TERMS), dtype=jnp.float32)
    got2 = jax.block_until_ready(
        pallas_library_norms(td2, th2, td_tile_rows=8, num_splits=2))
    ref2 = jnp.linalg.norm(td2) / jnp.linalg.norm(th2, axis=0)
    assert got2.shape == (M_TERMS,)
    assert jnp.allclose(got2, ref2, rtol=1e-4, atol=1e-6)

    print("KERNEL_OK")
</pallas_src>

<mosaic_0001>
module attributes {stable_mosaic.version = 11 : i64} {
  func.func @_sumsq_kernel(%arg0: i32, %arg1: i32, %arg2: memref<8x128xf32, #tpu.memory_space<vmem>>, %arg3: memref<64x128xf32, #tpu.memory_space<vmem>>, %arg4: memref<8x128xf32, #tpu.memory_space<vmem>>, %arg5: memref<8x128xf32, #tpu.memory_space<vmem>>) attributes {dimension_semantics = [#tpu.dimension_semantics<parallel>, #tpu.dimension_semantics<arbitrary>], iteration_bounds = array<i64: 1, 1>, scalar_prefetch = 0 : i64, scratch_operands = 0 : i64, tpu.core_type = #tpu.core_type<tc>, window_params = [{transform_indices = @transform_0, window_bounds = array<i64: 8, 128>}, {transform_indices = @transform_1, window_bounds = array<i64: 64, 128>}, {transform_indices = @transform_2, window_bounds = array<i64: 8, 128>}, {transform_indices = @transform_3, window_bounds = array<i64: 8, 128>}]} {
    %c0_i32 = arith.constant 0 : i32
    %0 = arith.cmpi eq, %arg1, %c0_i32 : i32
    %1 = arith.extui %0 : i1 to i32
    %c0_i32_0 = arith.constant 0 : i32
    %2 = arith.cmpi ne, %1, %c0_i32_0 : i32
    scf.if %2 {
      %cst_13 = arith.constant 0.000000e+00 : f32
      %17 = vector.broadcast %cst_13 : f32 to vector<8x128xf32>
      %c0_14 = arith.constant 0 : index
      %c0_15 = arith.constant 0 : index
      %18 = vector.load %arg4[%c0_14, %c0_15] : memref<8x128xf32, #tpu.memory_space<vmem>>, vector<8x128xf32>
      tpu.vector_store %arg4[%c0_14, %c0_15], %17 {strides = array<i32>} : memref<8x128xf32, #tpu.memory_space<vmem>>, vector<8x128xf32>,
      %cst_16 = arith.constant 0.000000e+00 : f32
      %19 = vector.broadcast %cst_16 : f32 to vector<8x128xf32>
      %c0_17 = arith.constant 0 : index
      %c0_18 = arith.constant 0 : index
      %20 = vector.load %arg5[%c0_17, %c0_18] : memref<8x128xf32, #tpu.memory_space<vmem>>, vector<8x128xf32>
      tpu.vector_store %arg5[%c0_17, %c0_18], %19 {strides = array<i32>} : memref<8x128xf32, #tpu.memory_space<vmem>>, vector<8x128xf32>,
    } else {
    }
    %c0 = arith.constant 0 : index
    %c0_1 = arith.constant 0 : index
    %3 = vector.load %arg2[%c0, %c0_1] : memref<8x128xf32, #tpu.memory_space<vmem>>, vector<8x128xf32>
    %c0_2 = arith.constant 0 : index
    %c0_3 = arith.constant 0 : index
    %4 = vector.load %arg3[%c0_2, %c0_3] : memref<64x128xf32, #tpu.memory_space<vmem>>, vector<64x128xf32>
    %c0_4 = arith.constant 0 : index
    %c0_5 = arith.constant 0 : index
    %5 = vector.load %arg4[%c0_4, %c0_5] : memref<8x128xf32, #tpu.memory_space<vmem>>, vector<1x128xf32>
    %6 = arith.mulf %3, %3 : vector<8x128xf32>
    %cst = arith.constant dense<0.000000e+00> : vector<128xf32>
    %7 = vector.multi_reduction <add>, %6, %cst [0] : vector<8x128xf32> to vector<128xf32>
    %8 = vector.shape_cast %7 : vector<128xf32> to vector<1x128xf32>
    %9 = arith.addf %5, %8 : vector<1x128xf32>
    %c0_6 = arith.constant 0 : index
    %c0_7 = arith.constant 0 : index
    %10 = vector.load %arg4[%c0_6, %c0_7] : memref<8x128xf32, #tpu.memory_space<vmem>>, vector<1x128xf32>
    tpu.vector_store %arg4[%c0_6, %c0_7], %9 {strides = array<i32>} : memref<8x128xf32, #tpu.memory_space<vmem>>, vector<1x128xf32>,
    %c0_8 = arith.constant 0 : index
    %c0_9 = arith.constant 0 : index
    %11 = vector.load %arg5[%c0_8, %c0_9] : memref<8x128xf32, #tpu.memory_space<vmem>>, vector<1x128xf32>
    %12 = arith.mulf %4, %4 : vector<64x128xf32>
    %cst_10 = arith.constant dense<0.000000e+00> : vector<128xf32>
    %13 = vector.multi_reduction <add>, %12, %cst_10 [0] : vector<64x128xf32> to vector<128xf32>
    %14 = vector.shape_cast %13 : vector<128xf32> to vector<1x128xf32>
    %15 = arith.addf %11, %14 : vector<1x128xf32>
    %c0_11 = arith.constant 0 : index
    %c0_12 = arith.constant 0 : index
    %16 = vector.load %arg5[%c0_11, %c0_12] : memref<8x128xf32, #tpu.memory_space<vmem>>, vector<1x128xf32>
    tpu.vector_store %arg5[%c0_11, %c0_12], %15 {strides = array<i32>} : memref<8x128xf32, #tpu.memory_space<vmem>>, vector<1x128xf32>,
    return
  }
  func.func @transform_0(%arg0: i32, %arg1: i32) -> (i32, i32) {
    %c1_i32 = arith.constant 1 : i32
    %0 = arith.muli %arg0, %c1_i32 : i32
    %1 = arith.addi %0, %arg1 : i32
    %c0_i32 = arith.constant 0 : i32
    %c0_i32_0 = arith.constant 0 : i32
    return %1, %c0_i32 : i32, i32
  }
  func.func @transform_1(%arg0: i32, %arg1: i32) -> (i32, i32) {
    %c1_i32 = arith.constant 1 : i32
    %0 = arith.muli %arg0, %c1_i32 : i32
    %1 = arith.addi %0, %arg1 : i32
    %c0_i32 = arith.constant 0 : i32
    %c0_i32_0 = arith.constant 0 : i32
    return %1, %c0_i32 : i32, i32
  }
  func.func @transform_2(%arg0: i32, %arg1: i32) -> (i32, i32) {
    %c0_i32 = arith.constant 0 : i32
    %c0_i32_0 = arith.constant 0 : i32
    return %arg0, %c0_i32 : i32, i32
  }
  func.func @transform_3(%arg0: i32, %arg1: i32) -> (i32, i32) {
    %c0_i32 = arith.constant 0 : i32
    %c0_i32_0 = arith.constant 0 : i32
    return %arg0, %c0_i32 : i32, i32
  }
}

</mosaic_0001>

<bundles_post_ra>
// kernel: pallas_library_norms.1
= control target key start
LH: loop header
LB: loop body
LE: loop exit
PB: predicated region body
PF: predicated region fallthrough
CT: control target
= control target key end

     0   :  { %v122_v0 = vmov 0.0   ;;  %s188_s2 = inlined_call_operand.vmem [shape: f32[8,128], index: 2, kind: output, shape index: {0}]   ;;  %s189_s3 = inlined_call_operand.vmem [shape: f32[8,128], index: 3, kind: output, shape index: {1}]   ;;  %s190_s0 = inlined_call_operand.vmem [shape: f32[8,128], index: 0, kind: input, shape index: {}]   ;;  %s191_s1 = inlined_call_operand.vmem [shape: f32[64,128], index: 1, kind: input, shape index: {}]  }
   0x1   :  { %56 = vst [vmem:[%s188_s2] sm:$0xff] %v122_v0  ;;  %57 = vst [vmem:[%s189_s3] sm:$0xff] %v122_v0  ;;  %v58_v1 = vld [vmem:[%s190_s0] sm:$0xff]  ;;  %v60_v3 = vld [vmem:[%s191_s1 + $0x8] sm:$0xff] }
   0x2   :  { %v59_v2 = vld [vmem:[%s191_s1] sm:$0xff]  ;;  %v68_v4 = vmul.f32 %v58_v1, %v58_v1  ;;  %v61_v5 = vld [vmem:[%s191_s1 + $0x10] sm:$0xff]  ;;  %v62_v6 = vld [vmem:[%s191_s1 + $0x18] sm:$0xff]  ;;  %v79_v8 = vmul.f32 %v60_v3, %v60_v3 }
   0x3   :  { %v78_v7 = vmul.f32 %v59_v2, %v59_v2  ;;  %v80_v9 = vmul.f32 %v61_v5, %v61_v5  ;;  %v63_v11 = vld [vmem:[%s191_s1 + $0x20] sm:$0xff]  ;;  %v81_v12 = vmul.f32 %v62_v6, %v62_v6  ;;  %v64_v15 = vld [vmem:[%s191_s1 + $0x28] sm:$0xff]  ;;  %v65_v19 = vld [vmem:[%s191_s1 + $0x30] sm:$0xff] }
   0x4   :  { %v69_v10 = vrot.slane %v68_v4, 4  ;;  %v82_v16 = vmul.f32 %v63_v11, %v63_v11  ;;  %v83_v20 = vmul.f32 %v64_v15, %v64_v15  ;;  %v66_v23 = vld [vmem:[%s191_s1 + $0x38] sm:$0xff]  ;;  %v84_v24 = vmul.f32 %v65_v19, %v65_v19 }
   0x5   :  { %v86_v13 = vadd.f32 %v79_v8, %v78_v7  ;;  %v85_v28 = vmul.f32 %v66_v23, %v66_v23 }
   0x6   :  { %v70_v14 = vadd.f32 %v69_v10, %v68_v4 }
   0x7   :  { %v87_v17 = vadd.f32 %v86_v13, %v80_v9 }
   0x8   :  { %v71_v18 = vrot.slane %v70_v14, 2  ;;  %v67_v27 = vld [vmem:[%s188_s2] sm:$0x1] }
   0x9   :  { %v88_v21 = vadd.f32 %v87_v17, %v81_v12  ;;  %v77_v39 = vld [vmem:[%s189_s3] sm:$0x1] }
   0xa   :  { %v72_v22 = vadd.f32 %v71_v18, %v70_v14 }
   0xb   :  { %v89_v25 = vadd.f32 %v88_v21, %v82_v16 }
   0xc   :  { %v73_v26 = vrot.slane %v72_v22, 1 }
   0xd   :  { %v90_v29 = vadd.f32 %v89_v25, %v83_v20 }
   0xe   :  { %v74_v30 = vadd.f32 %v73_v26, %v72_v22 }
   0xf   :  { %v91_v31 = vadd.f32 %v90_v29, %v84_v24 }
  0x10   :  { %v75_v32 = vadd.f32 %v74_v30, %v67_v27 }
  0x11   :  { %v92_v33 = vadd.f32 %v91_v31, %v85_v28 }
  0x12   :  { %76 = vst [vmem:[%s188_s2] sm:$0x1] %v75_v32 }
  0x13   :  { %v93_v34 = vrot.slane %v92_v33, 4 }
  0x15   :  { %v94_v35 = vadd.f32 %v93_v34, %v92_v33 }
  0x17   :  { %v95_v36 = vrot.slane %v94_v35, 2 }
  0x19   :  { %v96_v37 = vadd.f32 %v95_v36, %v94_v35 }
  0x1b   :  { %v97_v38 = vrot.slane %v96_v37, 1 }
  0x1d   :  { %v98_v40 = vadd.f32 %v97_v38, %v96_v37 }
  0x1f   :  { %v99_v41 = vadd.f32 %v98_v40, %v77_v39 }
  0x21   :  { %100 = vst [vmem:[%s189_s3] sm:$0x1] %v99_v41 }

</bundles_post_ra>
